<compile_context>
chip_gen: v5e
topology: v5e:2x2
jax: 0.10.0
libtpu: 0.0.40
codegen_flags: <defaults>
</compile_context>

<pallas_src>
import math

import jax
import jax.numpy as jnp
from jax.experimental import pallas as pl
from jax.experimental.pallas import tpu as pltpu


_LN_EPS = 1e-5
_INV_SQRT2 = 1.0 / math.sqrt(2.0)


def _round_up(x, m):
    return ((x + m - 1) // m) * m


def _cdiv(a, b):
    return -(-a // b)


def _choose_tile(batch, *, max_tile=4096, split_threshold=512):
    """Batch-tile selection.

    - multiple of 8 (sublane alignment)
    - single step for small batches (avoids pointless splitting)
    - for B > split_threshold: an EVEN number of grid steps (>=2) so the
      "parallel" grid axis can shard across v7x's two TensorCores, with the
      tile derived from cdiv(B, n_steps) so padding waste stays small
    - tiles capped at `max_tile` rows (amply fits VMEM at these widths).
    """
    bp8 = _round_up(max(batch, 1), 8)
    if bp8 <= split_threshold:
        return bp8
    n_steps = max(2, _cdiv(batch, max_tile))
    if n_steps % 2:
        n_steps += 1
    return _round_up(_cdiv(batch, n_steps), 8)


# ---------------------------------------------------------------------------
# Fused MLP kernel (built per configuration)
# ---------------------------------------------------------------------------
def _make_encoder_kernel(dims, *, multi_motion, prim_is_int, n_primitives,
                         approx_gelu):
    """Kernel ref order:
       state_ref, [prim_ref], vecs_ref, w_refs..., o_ref
    where vecs_ref packs (b_i, gamma_i, beta_i)*n_hidden + b_final row-wise.
    """
    n_layers = len(dims) - 1
    n_hidden = n_layers - 1

    def kernel(*refs):
        idx = 0
        state_ref = refs[idx]; idx += 1
        if multi_motion:
            prim_ref = refs[idx]; idx += 1
        vecs_ref = refs[idx]; idx += 1
        w_refs = refs[idx:-1]
        o_ref = refs[-1]

        vecs = vecs_ref[...]                       # (n_vecs, max_dim), tiny
        state = state_ref[...]                     # (tile, dim_state) f32
        tile = state.shape[0]
        inv_sqrt2 = jnp.float32(_INV_SQRT2)
        eps = jnp.float32(_LN_EPS)

        # ---- layer 0 pre-activation: one-hot + concat folded into two dots --
        wi = 0
        if multi_motion:
            w_state = w_refs[wi][...]; wi += 1     # (dim_state, dims[1])
            w_prim = w_refs[wi][...]; wi += 1      # (n_primitives, dims[1])
            if prim_is_int:
                pt = prim_ref[...]                 # (tile, 1) int32
                lanes = jax.lax.broadcasted_iota(
                    jnp.int32, (tile, n_primitives), 1)
                one_hot = (lanes == pt).astype(jnp.float32)
            else:
                one_hot = prim_ref[...]            # (tile, n_primitives) f32
            y = (jnp.dot(state, w_state, preferred_element_type=jnp.float32)
                 + jnp.dot(one_hot, w_prim, preferred_element_type=jnp.float32))
        else:
            y = jnp.dot(state, w_refs[wi][...],
                        preferred_element_type=jnp.float32)
            wi += 1

        h = None
        for i in range(n_layers):
            if i > 0:
                y = jnp.dot(h, w_refs[wi][...],
                            preferred_element_type=jnp.float32)
                wi += 1
            width = dims[i + 1]
            if i < n_hidden:
                b = vecs[3 * i:3 * i + 1, :width]
                g = vecs[3 * i + 1:3 * i + 2, :width]
                beta = vecs[3 * i + 2:3 * i + 3, :width]
                y = y + b
                # Two-pass LayerNorm (numerically stable, torch-exact).
                mu = jnp.mean(y, axis=-1, keepdims=True)
                d = y - mu
                var = jnp.mean(d * d, axis=-1, keepdims=True)
                yhat = d * jax.lax.rsqrt(var + eps) * g + beta
                if approx_gelu:
                    # tanh GELU -> EUP slot (near-free); ~1e-3 off torch exact.
                    h = jax.nn.gelu(yhat, approximate=True)
                else:
                    # Exact erf GELU (torch.nn.GELU default).
                    h = 0.5 * yhat * (1.0 + jax.lax.erf(yhat * inv_sqrt2))
            else:
                b_final = vecs[3 * n_hidden:3 * n_hidden + 1, :width]
                o_ref[...] = y + b_final

    return kernel


# ---------------------------------------------------------------------------
# Parameter init (torch-Linear-like) and one-time packing
# ---------------------------------------------------------------------------
def init_encoder_params(key, dim_state, latent_dim, hidden_layers,
                        n_primitives=1, multi_motion=False):
    """nn.Linear-style U[-1/sqrt(fan_in), 1/sqrt(fan_in)]; LN gamma=1, beta=0."""
    input_dim = dim_state + (n_primitives if multi_motion else 0)
    dims = [input_dim] + list(hidden_layers) + [latent_dim]
    params = []
    for i in range(len(dims) - 1):
        key, kw, kb = jax.random.split(key, 3)
        bound = 1.0 / math.sqrt(dims[i])
        w = jax.random.uniform(kw, (dims[i], dims[i + 1]), jnp.float32,
                               -bound, bound)
        b = jax.random.uniform(kb, (dims[i + 1],), jnp.float32, -bound, bound)
        layer = {"w": w, "b": b}
        if i < len(hidden_layers):
            layer["gamma"] = jnp.ones((dims[i + 1],), jnp.float32)
            layer["beta"] = jnp.zeros((dims[i + 1],), jnp.float32)
        params.append(layer)
    return params


def prepare_encoder_params(params, *, dim_state, n_primitives, multi_motion):
    """One-time repack into the kernel-friendly layout:
       - first weight split into (W_state, W_prim) when multi_motion
       - all 1-D vectors packed into one (n_vecs, max_dim) array."""
    dims = [params[0]["w"].shape[0]] + [p["w"].shape[1] for p in params]
    n_layers = len(params)
    n_hidden = n_layers - 1
    max_dim = max(dims[1:])

    weights = []
    w0 = params[0]["w"].astype(jnp.float32)
    if multi_motion:
        assert w0.shape[0] == dim_state + n_primitives
        weights.append(w0[:dim_state])        # W_state
        weights.append(w0[dim_state:])        # W_prim
    else:
        weights.append(w0)
    for p in params[1:]:
        weights.append(p["w"].astype(jnp.float32))

    n_vecs = 3 * n_hidden + 1
    vecs = jnp.zeros((n_vecs, max_dim), jnp.float32)
    for i in range(n_hidden):
        hw = dims[i + 1]
        vecs = vecs.at[3 * i, :hw].set(params[i]["b"].astype(jnp.float32))
        vecs = vecs.at[3 * i + 1, :hw].set(params[i]["gamma"].astype(jnp.float32))
        vecs = vecs.at[3 * i + 2, :hw].set(params[i]["beta"].astype(jnp.float32))
    vecs = vecs.at[3 * n_hidden, :dims[-1]].set(params[-1]["b"].astype(jnp.float32))

    return {
        "dims": tuple(dims),
        "weights": tuple(weights),
        "vecs": vecs,
        "dim_state": dim_state,
        "n_primitives": n_primitives,
        "multi_motion": multi_motion,
    }


# ---------------------------------------------------------------------------
# Forward: single pallas_call over a 1-D batch grid
# ---------------------------------------------------------------------------
def encoder_forward(packed, state, primitive_type=None, *,
                    approx_gelu=False, max_tile=4096):
    dims = packed["dims"]
    multi_motion = packed["multi_motion"]
    n_primitives = packed["n_primitives"]
    dim_state = packed["dim_state"]
    latent_dim = dims[-1]

    x = state.astype(jnp.float32)
    B = x.shape[0]

    prim = None
    prim_is_int = False
    if multi_motion:
        if jnp.issubdtype(primitive_type.dtype, jnp.integer):
            prim_is_int = True
            prim = primitive_type.reshape(B, 1).astype(jnp.int32)
        else:
            prim = primitive_type.astype(jnp.float32).reshape(B, n_primitives)

    tile = _choose_tile(B, max_tile=max_tile)
    Bp = _round_up(B, tile)
    if Bp != B:
        x = jnp.pad(x, ((0, Bp - B), (0, 0)))
        if prim is not None:
            prim = jnp.pad(prim, ((0, Bp - B), (0, 0)))

    ops = [x]
    in_specs = [pl.BlockSpec((tile, dim_state), lambda i: (i, 0))]
    if multi_motion:
        ops.append(prim)
        in_specs.append(pl.BlockSpec((tile, prim.shape[1]), lambda i: (i, 0)))
    vecs = packed["vecs"]
    ops.append(vecs)
    in_specs.append(pl.BlockSpec(vecs.shape, lambda i: (0, 0)))
    for w in packed["weights"]:
        ops.append(w)
        in_specs.append(pl.BlockSpec(w.shape, lambda i: (0, 0)))

    # Explicit VMEM budget (2x headroom), capped at v7x's 64 MiB physical VMEM.
    max_dim = max(dims[1:])
    prim_cols = prim.shape[1] if prim is not None else 0
    act_bytes = 4 * tile * max(max_dim, dim_state) * 6
    io_bytes = 2 * 4 * tile * (dim_state + prim_cols + latent_dim)
    param_bytes = 2 * 4 * (sum(int(w.size) for w in packed["weights"])
                           + int(vecs.size))
    vmem_limit = int(min(64 * 1024 * 1024,
                         max(32 * 1024 * 1024,
                             2 * (act_bytes + io_bytes + param_bytes))))

    kernel = _make_encoder_kernel(
        dims, multi_motion=multi_motion, prim_is_int=prim_is_int,
        n_primitives=n_primitives, approx_gelu=approx_gelu)

    out = pl.pallas_call(
        kernel,
        out_shape=jax.ShapeDtypeStruct((Bp, latent_dim), jnp.float32),
        grid_spec=pl.GridSpec(
            grid=(Bp // tile,),
            in_specs=in_specs,
            out_specs=pl.BlockSpec((tile, latent_dim), lambda i: (i, 0)),
        ),
        compiler_params=pltpu.CompilerParams(
            dimension_semantics=("parallel",),
            vmem_limit_bytes=vmem_limit,
        ),
    )(*ops)

    return out[:B] if Bp != B else out


# ---------------------------------------------------------------------------
# Pure-JAX reference (mirrors the torch module) for sanity checks
# ---------------------------------------------------------------------------
def encoder_reference(params, state, primitive_type=None, *,
                      n_primitives=1, multi_motion=False):
    x = state.astype(jnp.float32)
    if multi_motion:
        if jnp.issubdtype(primitive_type.dtype, jnp.integer):
            one_hot = jax.nn.one_hot(primitive_type, n_primitives,
                                     dtype=jnp.float32)
        else:
            one_hot = primitive_type.astype(jnp.float32)
        x = jnp.concatenate([x, one_hot], axis=1)
    n_layers = len(params)
    for i, layer in enumerate(params):
        x = x @ layer["w"] + layer["b"]
        if i < n_layers - 1:
            mu = jnp.mean(x, axis=-1, keepdims=True)
            var = jnp.mean((x - mu) ** 2, axis=-1, keepdims=True)
            x = (x - mu) * jax.lax.rsqrt(var + _LN_EPS)
            x = x * layer["gamma"] + layer["beta"]
            x = 0.5 * x * (1.0 + jax.lax.erf(x / jnp.sqrt(2.0)))
    return x


if __name__ == "__main__":
    dim_state = 16
    latent_dim = 8
    hidden_layers = [32, 32]
    n_primitives = 4
    multi_motion = True

    key = jax.random.PRNGKey(0)
    kp, ks1, kt1, ks2, kt2, ks3, kt3 = jax.random.split(key, 7)

    raw = init_encoder_params(kp, dim_state, latent_dim, hidden_layers,
                              n_primitives=n_primitives,
                              multi_motion=multi_motion)
    packed = prepare_encoder_params(raw, dim_state=dim_state,
                                    n_primitives=n_primitives,
                                    multi_motion=multi_motion)

    # Case 1: small batch, integer primitive ids (one-hot built in-kernel).
    b1 = 16
    s1 = jax.random.normal(ks1, (b1, dim_state), jnp.float32)
    p1 = jax.random.randint(kt1, (b1,), 0, n_primitives, jnp.int32)
    e1 = jax.block_until_ready(encoder_forward(packed, s1, p1))
    r1 = encoder_reference(raw, s1, p1, n_primitives=n_primitives,
                           multi_motion=multi_motion)
    assert e1.shape == (b1, latent_dim)
    assert jnp.allclose(e1, r1, atol=5e-5, rtol=1e-4), "case1 mismatch"

    # Case 2: ragged batch (exercises the pad + slice path).
    b2 = 13
    s2 = jax.random.normal(ks2, (b2, dim_state), jnp.float32)
    p2 = jax.random.randint(kt2, (b2,), 0, n_primitives, jnp.int32)
    e2 = jax.block_until_ready(encoder_forward(packed, s2, p2))
    r2 = encoder_reference(raw, s2, p2, n_primitives=n_primitives,
                           multi_motion=multi_motion)
    assert e2.shape == (b2, latent_dim)
    assert jnp.allclose(e2, r2, atol=5e-5, rtol=1e-4), "case2 mismatch"

    # Case 3: batch > split threshold (2 grid steps) + float one-hot input.
    b3 = 528
    s3 = jax.random.normal(ks3, (b3, dim_state), jnp.float32)
    p3_idx = jax.random.randint(kt3, (b3,), 0, n_primitives, jnp.int32)
    p3 = jax.nn.one_hot(p3_idx, n_primitives, dtype=jnp.float32)
    e3 = jax.block_until_ready(encoder_forward(packed, s3, p3))
    r3 = encoder_reference(raw, s3, p3, n_primitives=n_primitives,
                           multi_motion=multi_motion)
    assert e3.shape == (b3, latent_dim)
    assert jnp.allclose(e3, r3, atol=5e-5, rtol=1e-4), "case3 mismatch"

    print("KERNEL_OK")
</pallas_src>

<mosaic_0001>
module attributes {stable_mosaic.version = 11 : i64} {
  func.func @kernel(%arg0: i32, %arg1: memref<16x16xf32, #tpu.memory_space<vmem>>, %arg2: memref<16x1xi32, #tpu.memory_space<vmem>>, %arg3: memref<7x32xf32, #tpu.memory_space<vmem>>, %arg4: memref<16x32xf32, #tpu.memory_space<vmem>>, %arg5: memref<4x32xf32, #tpu.memory_space<vmem>>, %arg6: memref<32x32xf32, #tpu.memory_space<vmem>>, %arg7: memref<32x8xf32, #tpu.memory_space<vmem>>, %arg8: memref<16x8xf32, #tpu.memory_space<vmem>>) attributes {dimension_semantics = [#tpu.dimension_semantics<parallel>], iteration_bounds = array<i64: 1>, scalar_prefetch = 0 : i64, scratch_operands = 0 : i64, tpu.core_type = #tpu.core_type<tc>, window_params = [{transform_indices = @transform_0, window_bounds = array<i64: 16, 16>}, {transform_indices = @transform_1, window_bounds = array<i64: 16, 1>}, {pipeline_mode = #tpu.pipeline_mode<synchronous>, transform_indices = @transform_2, window_bounds = array<i64: 7, 32>}, {pipeline_mode = #tpu.pipeline_mode<synchronous>, transform_indices = @transform_3, window_bounds = array<i64: 16, 32>}, {pipeline_mode = #tpu.pipeline_mode<synchronous>, transform_indices = @transform_4, window_bounds = array<i64: 4, 32>}, {pipeline_mode = #tpu.pipeline_mode<synchronous>, transform_indices = @transform_5, window_bounds = array<i64: 32, 32>}, {pipeline_mode = #tpu.pipeline_mode<synchronous>, transform_indices = @transform_6, window_bounds = array<i64: 32, 8>}, {transform_indices = @transform_7, window_bounds = array<i64: 16, 8>}]} {
    %c0 = arith.constant 0 : index
    %c0_0 = arith.constant 0 : index
    %0 = vector.load %arg3[%c0, %c0_0] : memref<7x32xf32, #tpu.memory_space<vmem>>, vector<7x32xf32>
    %c0_1 = arith.constant 0 : index
    %c0_2 = arith.constant 0 : index
    %1 = vector.load %arg1[%c0_1, %c0_2] : memref<16x16xf32, #tpu.memory_space<vmem>>, vector<16x16xf32>
    %c0_3 = arith.constant 0 : index
    %c0_4 = arith.constant 0 : index
    %2 = vector.load %arg4[%c0_3, %c0_4] : memref<16x32xf32, #tpu.memory_space<vmem>>, vector<16x32xf32>
    %c0_5 = arith.constant 0 : index
    %c0_6 = arith.constant 0 : index
    %3 = vector.load %arg5[%c0_5, %c0_6] : memref<4x32xf32, #tpu.memory_space<vmem>>, vector<4x32xf32>
    %c0_7 = arith.constant 0 : index
    %c0_8 = arith.constant 0 : index
    %4 = vector.load %arg2[%c0_7, %c0_8] : memref<16x1xi32, #tpu.memory_space<vmem>>, vector<16x1xi32>
    %5 = tpu.iota {dimensions = array<i32: 1>} : vector<16x4xi32>
    %6 = vector.broadcast %4 : vector<16x1xi32> to vector<16x4xi32>
    %7 = arith.cmpi eq, %5, %6 : vector<16x4xi32>
    %8 = arith.extui %7 : vector<16x4xi1> to vector<16x4xi32>
    %9 = arith.sitofp %8 : vector<16x4xi32> to vector<16x4xf32>
    %cst = arith.constant dense<0.000000e+00> : vector<16x32xf32>
    %10 = tpu.matmul %1, %2, %cst {dimension_numbers = #tpu.dot_dimension_numbers<[1], [0], [0], [1], [0, 0, 1, 1], [], []>} : vector<16x16xf32>, vector<16x32xf32>, vector<16x32xf32> -> vector<16x32xf32>
    %cst_9 = arith.constant dense<0.000000e+00> : vector<16x32xf32>
    %11 = tpu.matmul %9, %3, %cst_9 {dimension_numbers = #tpu.dot_dimension_numbers<[1], [0], [0], [1], [0, 0, 1, 1], [], []>} : vector<16x4xf32>, vector<4x32xf32>, vector<16x32xf32> -> vector<16x32xf32>
    %12 = arith.addf %10, %11 : vector<16x32xf32>
    %13 = vector.extract_strided_slice %0 {offsets = [0, 0], sizes = [1, 32], strides = [1, 1]} : vector<7x32xf32> to vector<1x32xf32>
    %14 = vector.extract_strided_slice %0 {offsets = [1, 0], sizes = [1, 32], strides = [1, 1]} : vector<7x32xf32> to vector<1x32xf32>
    %15 = vector.extract_strided_slice %0 {offsets = [2, 0], sizes = [1, 32], strides = [1, 1]} : vector<7x32xf32> to vector<1x32xf32>
    %16 = vector.broadcast %13 : vector<1x32xf32> to vector<16x32xf32>
    %17 = arith.addf %12, %16 : vector<16x32xf32>
    %cst_10 = arith.constant dense<0.000000e+00> : vector<16xf32>
    %18 = vector.multi_reduction <add>, %17, %cst_10 [1] : vector<16x32xf32> to vector<16xf32>
    %19 = vector.shape_cast %18 : vector<16xf32> to vector<16x1xf32>
    %cst_11 = arith.constant 3.200000e+01 : f32
    %20 = vector.broadcast %cst_11 : f32 to vector<16x1xf32>
    %21 = arith.divf %19, %20 : vector<16x1xf32>
    %22 = vector.broadcast %21 : vector<16x1xf32> to vector<16x32xf32>
    %23 = arith.subf %17, %22 : vector<16x32xf32>
    %24 = arith.mulf %23, %23 : vector<16x32xf32>
    %cst_12 = arith.constant dense<0.000000e+00> : vector<16xf32>
    %25 = vector.multi_reduction <add>, %24, %cst_12 [1] : vector<16x32xf32> to vector<16xf32>
    %26 = vector.shape_cast %25 : vector<16xf32> to vector<16x1xf32>
    %cst_13 = arith.constant 3.200000e+01 : f32
    %27 = vector.broadcast %cst_13 : f32 to vector<16x1xf32>
    %28 = arith.divf %26, %27 : vector<16x1xf32>
    %cst_14 = arith.constant 9.99999974E-6 : f32
    %29 = vector.broadcast %cst_14 : f32 to vector<16x1xf32>
    %30 = arith.addf %28, %29 : vector<16x1xf32>
    %31 = math.rsqrt %30 : vector<16x1xf32>
    %32 = vector.broadcast %31 : vector<16x1xf32> to vector<16x32xf32>
    %33 = arith.mulf %23, %32 : vector<16x32xf32>
    %34 = vector.broadcast %14 : vector<1x32xf32> to vector<16x32xf32>
    %35 = arith.mulf %33, %34 : vector<16x32xf32>
    %36 = vector.broadcast %15 : vector<1x32xf32> to vector<16x32xf32>
    %37 = arith.addf %35, %36 : vector<16x32xf32>
    %cst_15 = arith.constant 5.000000e-01 : f32
    %38 = vector.broadcast %cst_15 : f32 to vector<16x32xf32>
    %39 = arith.mulf %38, %37 : vector<16x32xf32>
    %cst_16 = arith.constant 0.707106769 : f32
    %40 = vector.broadcast %cst_16 : f32 to vector<16x32xf32>
    %41 = arith.mulf %37, %40 : vector<16x32xf32>
    %42 = math.erf %41 : vector<16x32xf32>
    %cst_17 = arith.constant 1.000000e+00 : f32
    %43 = vector.broadcast %cst_17 : f32 to vector<16x32xf32>
    %44 = arith.addf %43, %42 : vector<16x32xf32>
    %45 = arith.mulf %39, %44 : vector<16x32xf32>
    %c0_18 = arith.constant 0 : index
    %c0_19 = arith.constant 0 : index
    %46 = vector.load %arg6[%c0_18, %c0_19] : memref<32x32xf32, #tpu.memory_space<vmem>>, vector<32x32xf32>
    %cst_20 = arith.constant dense<0.000000e+00> : vector<16x32xf32>
    %47 = tpu.matmul %45, %46, %cst_20 {dimension_numbers = #tpu.dot_dimension_numbers<[1], [0], [0], [1], [0, 0, 1, 1], [], []>} : vector<16x32xf32>, vector<32x32xf32>, vector<16x32xf32> -> vector<16x32xf32>
    %48 = vector.extract_strided_slice %0 {offsets = [3, 0], sizes = [1, 32], strides = [1, 1]} : vector<7x32xf32> to vector<1x32xf32>
    %49 = vector.extract_strided_slice %0 {offsets = [4, 0], sizes = [1, 32], strides = [1, 1]} : vector<7x32xf32> to vector<1x32xf32>
    %50 = vector.extract_strided_slice %0 {offsets = [5, 0], sizes = [1, 32], strides = [1, 1]} : vector<7x32xf32> to vector<1x32xf32>
    %51 = vector.broadcast %48 : vector<1x32xf32> to vector<16x32xf32>
    %52 = arith.addf %47, %51 : vector<16x32xf32>
    %cst_21 = arith.constant dense<0.000000e+00> : vector<16xf32>
    %53 = vector.multi_reduction <add>, %52, %cst_21 [1] : vector<16x32xf32> to vector<16xf32>
    %54 = vector.shape_cast %53 : vector<16xf32> to vector<16x1xf32>
    %cst_22 = arith.constant 3.200000e+01 : f32
    %55 = vector.broadcast %cst_22 : f32 to vector<16x1xf32>
    %56 = arith.divf %54, %55 : vector<16x1xf32>
    %57 = vector.broadcast %56 : vector<16x1xf32> to vector<16x32xf32>
    %58 = arith.subf %52, %57 : vector<16x32xf32>
    %59 = arith.mulf %58, %58 : vector<16x32xf32>
    %cst_23 = arith.constant dense<0.000000e+00> : vector<16xf32>
    %60 = vector.multi_reduction <add>, %59, %cst_23 [1] : vector<16x32xf32> to vector<16xf32>
    %61 = vector.shape_cast %60 : vector<16xf32> to vector<16x1xf32>
    %cst_24 = arith.constant 3.200000e+01 : f32
    %62 = vector.broadcast %cst_24 : f32 to vector<16x1xf32>
    %63 = arith.divf %61, %62 : vector<16x1xf32>
    %cst_25 = arith.constant 9.99999974E-6 : f32
    %64 = vector.broadcast %cst_25 : f32 to vector<16x1xf32>
    %65 = arith.addf %63, %64 : vector<16x1xf32>
    %66 = math.rsqrt %65 : vector<16x1xf32>
    %67 = vector.broadcast %66 : vector<16x1xf32> to vector<16x32xf32>
    %68 = arith.mulf %58, %67 : vector<16x32xf32>
    %69 = vector.broadcast %49 : vector<1x32xf32> to vector<16x32xf32>
    %70 = arith.mulf %68, %69 : vector<16x32xf32>
    %71 = vector.broadcast %50 : vector<1x32xf32> to vector<16x32xf32>
    %72 = arith.addf %70, %71 : vector<16x32xf32>
    %cst_26 = arith.constant 5.000000e-01 : f32
    %73 = vector.broadcast %cst_26 : f32 to vector<16x32xf32>
    %74 = arith.mulf %73, %72 : vector<16x32xf32>
    %cst_27 = arith.constant 0.707106769 : f32
    %75 = vector.broadcast %cst_27 : f32 to vector<16x32xf32>
    %76 = arith.mulf %72, %75 : vector<16x32xf32>
    %77 = math.erf %76 : vector<16x32xf32>
    %cst_28 = arith.constant 1.000000e+00 : f32
    %78 = vector.broadcast %cst_28 : f32 to vector<16x32xf32>
    %79 = arith.addf %78, %77 : vector<16x32xf32>
    %80 = arith.mulf %74, %79 : vector<16x32xf32>
    %c0_29 = arith.constant 0 : index
    %c0_30 = arith.constant 0 : index
    %81 = vector.load %arg7[%c0_29, %c0_30] : memref<32x8xf32, #tpu.memory_space<vmem>>, vector<32x8xf32>
    %cst_31 = arith.constant dense<0.000000e+00> : vector<16x8xf32>
    %82 = tpu.matmul %80, %81, %cst_31 {dimension_numbers = #tpu.dot_dimension_numbers<[1], [0], [0], [1], [0, 0, 1, 1], [], []>} : vector<16x32xf32>, vector<32x8xf32>, vector<16x8xf32> -> vector<16x8xf32>
    %83 = vector.extract_strided_slice %0 {offsets = [6, 0], sizes = [1, 8], strides = [1, 1]} : vector<7x32xf32> to vector<1x8xf32>
    %84 = vector.broadcast %83 : vector<1x8xf32> to vector<16x8xf32>
    %85 = arith.addf %82, %84 : vector<16x8xf32>
    %c0_32 = arith.constant 0 : index
    %c0_33 = arith.constant 0 : index
    %86 = vector.load %arg8[%c0_32, %c0_33] : memref<16x8xf32, #tpu.memory_space<vmem>>, vector<16x8xf32>
    tpu.vector_store %arg8[%c0_32, %c0_33], %85 {strides = array<i32>} : memref<16x8xf32, #tpu.memory_space<vmem>>, vector<16x8xf32>,
    return
  }
  func.func @transform_0(%arg0: i32) -> (i32, i32) {
    %c0_i32 = arith.constant 0 : i32
    %c0_i32_0 = arith.constant 0 : i32
    return %arg0, %c0_i32 : i32, i32
  }
  func.func @transform_1(%arg0: i32) -> (i32, i32) {
    %c0_i32 = arith.constant 0 : i32
    %c0_i32_0 = arith.constant 0 : i32
    return %arg0, %c0_i32 : i32, i32
  }
  func.func @transform_2(%arg0: i32) -> (i32, i32) {
    %c0_i32 = arith.constant 0 : i32
    %c0_i32_0 = arith.constant 0 : i32
    %c0_i32_1 = arith.constant 0 : i32
    return %c0_i32, %c0_i32_0 : i32, i32
  }
  func.func @transform_3(%arg0: i32) -> (i32, i32) {
    %c0_i32 = arith.constant 0 : i32
    %c0_i32_0 = arith.constant 0 : i32
    %c0_i32_1 = arith.constant 0 : i32
    return %c0_i32, %c0_i32_0 : i32, i32
  }
  func.func @transform_4(%arg0: i32) -> (i32, i32) {
    %c0_i32 = arith.constant 0 : i32
    %c0_i32_0 = arith.constant 0 : i32
    %c0_i32_1 = arith.constant 0 : i32
    return %c0_i32, %c0_i32_0 : i32, i32
  }
  func.func @transform_5(%arg0: i32) -> (i32, i32) {
    %c0_i32 = arith.constant 0 : i32
    %c0_i32_0 = arith.constant 0 : i32
    %c0_i32_1 = arith.constant 0 : i32
    return %c0_i32, %c0_i32_0 : i32, i32
  }
  func.func @transform_6(%arg0: i32) -> (i32, i32) {
    %c0_i32 = arith.constant 0 : i32
    %c0_i32_0 = arith.constant 0 : i32
    %c0_i32_1 = arith.constant 0 : i32
    return %c0_i32, %c0_i32_0 : i32, i32
  }
  func.func @transform_7(%arg0: i32) -> (i32, i32) {
    %c0_i32 = arith.constant 0 : i32
    %c0_i32_0 = arith.constant 0 : i32
    return %arg0, %c0_i32 : i32, i32
  }
}

</mosaic_0001>

<bundles_post_ra>
// kernel: tpu_custom_call.1
= control target key start
LH: loop header
LB: loop body
LE: loop exit
PB: predicated region body
PF: predicated region fallthrough
CT: control target
= control target key end

     0   :  { %12 = vsyncpa [#allocation3], 0  ;;  %s759_s0 = inlined_call_operand.vmem [shape: f32[16,16], index: 0, kind: input, shape index: {}]   ;;  %s760_s1 = inlined_call_operand.vmem [shape: s32[16,1], index: 1, kind: input, shape index: {}]   ;;  %s761_s2 = inlined_call_operand.hbm [shape: f32[7,32], index: 2, kind: input, shape index: {}]   ;;  %s762_s3 = inlined_call_operand.hbm [shape: f32[16,32], index: 3, kind: input, shape index: {}]   ;;  %s763_s4 = inlined_call_operand.vmem [shape: f32[4,32], index: 4, kind: input, shape index: {}]   ;;  %s764_s5 = inlined_call_operand.vmem [shape: f32[32,32], index: 5, kind: input, shape index: {}]   ;;  %s765_s6 = inlined_call_operand.vmem [shape: f32[32,8], index: 6, kind: input, shape index: {}]   ;;  %s766_s7 = inlined_call_operand.vmem [shape: f32[16,8], index: 7, kind: output, shape index: {}]  }
   0x1   :  { %s23_s26 = sshll.u32 %s761_s2, 4  ;;  %s24_s26 = int_to_ptr.hbm [resolvable:$true] %s23_s26 }
   0x2   :  { %13 = vsyncpa [#allocation5], 0  ;;  %s599_s27 = smov [#allocation2]   ;;  %s33_s8 = sshll.u32 %s762_s3, 4  ;;  %s34_s8 = int_to_ptr.hbm [resolvable:$true] %s33_s8 }
   0x3   :  { %s25_s28 = sshll.u32 %s599_s27, 4  ;;  %s600_s9 = smov [#allocation4]   ;;  %s26_s28 = int_to_ptr.vmem [resolvable:$true] %s25_s28 }
   0x4   :  { %28 = dma.hbm_to_vmem [thread:$0]  %s24_s26, 128, %s26_s28, [#allocation3]  }
   0x5   :  { %s35_s10 = sshll.u32 %s600_s9, 4  ;;  %s601_s11 = smov 128   ;;  %s36_s10 = int_to_ptr.vmem [resolvable:$true] %s35_s10 }
   0x6   :  { %s602_s12 = smov 8  }
   0x7   :  { %41 = dma.hbm_to_vmem [thread:$0]  %s34_s8, 256, %s36_s10, [#allocation5], %s601_s11, %s601_s11, %s602_s12  }
   0x8   :  { %595 = dma.done.wait [#allocation3], 128  }
   0x9   :  { %596 = vsyncadd [#allocation3], 4294967168 }
   0xa   :  { %597 = dma.done.wait [#allocation5], 256  }
   0xb   :  { %598 = vsyncadd [#allocation5], 4294967040  ;;  %v603_v0 = vmov 0   ;;  %v62_v1 = vld [vmem:[%s760_s1] sm:$0xff]  ;;  %v63_v2 = vld [vmem:[%s760_s1 + $0x8] sm:$0xff]  ;;  %vm85_vm0 = vcmask 1043456   ;;  %v64_v8 = vlaneseq }
   0xc   :  { %528 = vset.pattern.permute.xlu0 %v603_v0  ;;  %v60_v3 = vld [vmem:[#allocation4 + $0x8] sm:$0xff]  ;;  %v61_v4 = vld [vmem:[%s763_s4] sm:$0xf]  ;;  %v59_v5 = vld [vmem:[#allocation4] sm:$0xff]  ;;  %vm112_vm1 = vcmask 130048   ;;  %vm78_vm2 = vcmask 31744  }
   0xd   :  { %67 = vperm.xlu0 %528, %v62_v1   ;;  %133 = vmatpush.msra.mxu1 %v60_v3  ;;  %v57_v6 = vld [vmem:[%s759_s0] sm:$0xff]  ;;  %v58_v7 = vld [vmem:[%s759_s0 + $0x8] sm:$0xff]  ;;  %v65_v9 = vand.u32 127, %v64_v8  ;;  %v604_v11 = vmov 0.0   ;;  %vm145_vm5 = vcmask 261120   ;;  %v605_v27 = vmov 32.0  }
   0xe   :  { %508 = vmatpush.msk.msra.mxu0 %vm85_vm0, %v61_v4  ;;  %v667_v16 = vld [vmem:[#allocation2] sm:$0x7f]  ;;  %529 = vrcp.f32 %v605_v27  ;;  %v294_v44 = vld [vmem:[%s764_s5 + $0x18] sm:$0xff]  ;;  %v293_v45 = vld [vmem:[%s764_s5 + $0x10] sm:$0xff] }
   0xf   :  { %134 = vmatpush.msra.mxu1 %v59_v5  ;;  %v142_v17 = vperm.slane %v667_v16, 0  ;;  %314 = vmatpush.msra.mxu2 %v294_v44  ;;  %v292_v48 = vld [vmem:[%s764_s5 + $0x8] sm:$0xff]  ;;  %v291_v50 = vld [vmem:[%s764_s5] sm:$0xff]  ;;  %v197_v62 = vperm.slane %v667_v16, 1 }
  0x10   :  { %511 = vmatmul.msk.f32.vlgmr.msra.gmra.mxu1 %vm112_vm1, %v57_v6 }
  0x11   :  { %315 = vmatpush.msra.mxu2 %v293_v45 }
  0x13   :  { %316 = vmatpush.msra.mxu2 %v292_v48 }
  0x14   :  { %v530_v28 = vpop.eup %529 }
  0x15   :  { %70 = vperm.xlu0 %528, %v63_v2   ;;  %v153_v29 = vmul.f32 32.0, %v530_v28  ;;  %vm157_vm6 = vweird.f32 %v530_v28  ;;  %317 = vmatpush.msra.mxu2 %v291_v50  ;;  %v200_v2 = vperm.slane %v667_v16, 2 }
  0x17   :  { %v154_v30 = vsub.f32 1.0, %v153_v29 }
  0x18   :  { %512 = vmatmul.msk.f32.gmra.mxu1 %vm112_vm1, %v58_v7 }
  0x19   :  { %v155_v31 = vmul.f32 %v530_v28, %v154_v30 }
  0x1b   :  { %v156_v32 = vadd.f32 %v530_v28, %v155_v31 }
  0x1d   :  { %v672_v33 = vsel %vm157_vm6, %v530_v28, %v156_v32 }
  0x7f   :  { %v68_v10 = vpop.permute.xlu0 %67 }
  0x80   :  { %vm72_vm3 = vcmp.eq.s32.totalorder %v65_v9, %v68_v10 }
  0x81   :  { %v506_v12 = vsel %vm72_vm3, 1.0, %v604_v11 }
  0x82   :  { %509 = vmatmul.msk.f32.vlgmr.msra.gmra.mxu0 %vm78_vm2, %v506_v12 }
  0x87   :  { %v71_v13 = vpop.permute.xlu0 %70 }
  0x88   :  { %vm73_vm4 = vcmp.eq.s32.totalorder %v65_v9, %v71_v13 }
  0x89   :  { %v507_v14 = vsel %vm73_vm4, 1.0, %v604_v11 }
  0x8a   :  { %510 = vmatmul.msk.f32.gmra.mxu0 %vm78_vm2, %v507_v14 }
  0x8d   :  { %v136_v15 = vpop.f32.mrf.mxu1 }
  0x95   :  { %v139_v22 = vpop.f32.mrf.mxu1 }
  0xff   :  { %v106_v18 = vpop.f32.mrf.mxu0 }
 0x100   :  { %v137_v19 = vadd.f32 %v136_v15, %v106_v18 }
 0x102   :  { %v143_v20 = vadd.f32 %v142_v17, %v137_v19 }
 0x104   :  { %v146_v21 = vsel %vm145_vm5, %v143_v20, 0.0 }
 0x105   :  { %147 = vadd.xlane.f32.xlu1 %v146_v21 }
 0x107   :  { %v109_v23 = vpop.f32.mrf.mxu0 }
 0x108   :  { %v140_v24 = vadd.f32 %v139_v22, %v109_v23 }
 0x10a   :  { %v144_v25 = vadd.f32 %v142_v17, %v140_v24 }
 0x10c   :  { %v149_v26 = vsel %vm145_vm5, %v144_v25, 0.0 }
 0x10d   :  { %150 = vadd.xlane.f32.xlu1 %v149_v26 }
 0x178   :  { %v148_v34 = vpop.xlane.xlu1 %147 }
 0x179   :  { %v159_v35 = vmul.f32 %v672_v33, %v148_v34 }
 0x17b   :  { %v161_v36 = vsub.f32 %v143_v20, %v159_v35 }
 0x17d   :  { %v163_v37 = vmul.f32 %v161_v36, %v161_v36 }
 0x17f   :  { %v165_v38 = vsel %vm145_vm5, %v163_v37, 0.0 }
 0x180   :  { %166 = vadd.xlane.f32.xlu2 %v165_v38  ;;  %v151_v39 = vpop.xlane.xlu1 %150 }
 0x181   :  { %v160_v40 = vmul.f32 %v672_v33, %v151_v39 }
 0x183   :  { %v162_v41 = vsub.f32 %v144_v25, %v160_v40 }
 0x185   :  { %v164_v42 = vmul.f32 %v162_v41, %v162_v41 }
 0x187   :  { %v168_v43 = vsel %vm145_vm5, %v164_v42, 0.0 }
 0x188   :  { %169 = vadd.xlane.f32.xlu2 %v168_v43 }
 0x1f3   :  { %v167_v46 = vpop.xlane.xlu2 %166 }
 0x1f4   :  { %v171_v47 = vmul.f32 %v167_v46, %v672_v33 }
 0x1f6   :  { %v173_v49 = vadd.f32 1e-05, %v171_v47 }
 0x1f8   :  { %531 = vrsqrt.f32 %v173_v49  ;;  %vm181_vm8 = vweird.f32 %v173_v49 }
 0x1fb   :  { %v170_v51 = vpop.xlane.xlu2 %169 }
 0x1fc   :  { %v172_v52 = vmul.f32 %v170_v51, %v672_v33 }
 0x1fe   :  { %v532_v53 = vpop.eup %531  ;;  %v174_v54 = vadd.f32 1e-05, %v172_v52 }
 0x1ff   :  { %v176_v55 = vmul.f32 %v532_v53, %v173_v49  ;;  %vm182_vm7 = vweird.f32 %v532_v53 }
 0x200   :  { %533 = vrsqrt.f32 %v174_v54  ;;  %vm183_vm9 = vmor %vm181_vm8, %vm182_vm7  ;;  %vm191_vm11 = vweird.f32 %v174_v54 }
 0x201   :  { %v177_v56 = vmul.f32 %v532_v53, %v176_v55 }
 0x203   :  { %v178_v57 = vmul.f32 0.5, %v177_v56 }
 0x205   :  { %v179_v58 = vsub.f32 1.5, %v178_v57 }
 0x206   :  { %v534_v59 = vpop.eup %533 }
 0x207   :  { %v180_v60 = vmul.f32 %v532_v53, %v179_v58  ;;  %v186_v61 = vmul.f32 %v534_v59, %v174_v54  ;;  %vm192_vm10 = vweird.f32 %v534_v59 }
 0x208   :  { %vm193_vm12 = vmor %vm191_vm11, %vm192_vm10 }
 0x209   :  { %v184_v63 = vsel %vm183_vm9, %v532_v53, %v180_v60  ;;  %v187_v0 = vmul.f32 %v534_v59, %v186_v61 }
 0x20a   :  { %v195_v1 = vmul.f32 %v184_v63, %v161_v36 }
 0x20b   :  { %v188_v3 = vmul.f32 0.5, %v187_v0 }
 0x20c   :  { %v198_v4 = vmul.f32 %v197_v62, %v195_v1 }
 0x20d   :  { %v189_v5 = vsub.f32 1.5, %v188_v3 }
 0x20e   :  { %v694_v6 = vadd.f32 %v200_v2, %v198_v4 }
 0x20f   :  { %v190_v7 = vmul.f32 %v534_v59, %v189_v5 }
 0x210   :  { %v205_v8 = vmul.f32 0.70710677, %v694_v6 }
 0x211   :  { %v194_v9 = vsel %vm193_vm12, %v534_v59, %v190_v7 }
 0x212   :  { %v196_v10 = vmul.f32 %v194_v9, %v162_v41  ;;  %v207_v11 = vmul.f32 %v205_v8, %v205_v8 }
 0x214   :  { %v208_v12 = vmin.f32 %v207_v11, 16.0  ;;  %v199_v13 = vmul.f32 %v197_v62, %v196_v10 }
 0x216   :  { %v209_v14 = vmul.f32 2.1237322e-06, %v208_v12  ;;  %v220_v15 = vmul.f32 3.8918573e-05, %v208_v12  ;;  %v697_v17 = vadd.f32 %v200_v2, %v199_v13 }
 0x218   :  { %v210_v18 = vadd.f32 0.00028619796, %v209_v14  ;;  %v221_v19 = vadd.f32 0.001143296, %v220_v15  ;;  %v700_v20 = vmul.f32 0.70710677, %v697_v17 }
 0x21a   :  { %v211_v21 = vmul.f32 %v210_v18, %v208_v12  ;;  %v222_v22 = vmul.f32 %v221_v19, %v208_v12  ;;  %v247_v23 = vmul.f32 %v700_v20, %v700_v20  ;;  %v203_v19 = vmul.f32 0.5, %v694_v6 }
 0x21b   :  { %v295_v6 = vperm.slane %v667_v16, 3 }
 0x21c   :  { %v223_v24 = vadd.f32 0.014752088, %v222_v22  ;;  %v212_v25 = vadd.f32 0.0036580483, %v211_v21  ;;  %v248_v26 = vmin.f32 %v247_v23, 16.0 }
 0x21e   :  { %v224_v27 = vmul.f32 %v223_v24, %v208_v12  ;;  %v249_v28 = vmul.f32 2.1237322e-06, %v248_v26  ;;  %v260_v29 = vmul.f32 3.8918573e-05, %v248_v26  ;;  %v213_v31 = vmul.f32 %v212_v25, %v208_v12 }
 0x220   :  { %v225_v30 = vadd.f32 0.112945676, %v224_v27  ;;  %v250_v32 = vadd.f32 0.00028619796, %v249_v28  ;;  %v261_v34 = vadd.f32 0.001143296, %v260_v29 }
 0x221   :  { %v214_v39 = vadd.f32 0.05243302, %v213_v31  ;;  %v204_v29 = vmul.f32 0.5, %v697_v17 }
 0x222   :  { %v226_v35 = vmul.f32 %v225_v30, %v208_v12  ;;  %v251_v36 = vmul.f32 %v250_v32, %v248_v26  ;;  %v262_v37 = vmul.f32 %v261_v34, %v248_v26 }
 0x223   :  { %v215_v45 = vmul.f32 %v214_v39, %v208_v12 }
 0x224   :  { %v227_v38 = vadd.f32 0.4994258, %v226_v35  ;;  %v263_v40 = vadd.f32 0.014752088, %v262_v37  ;;  %v252_v42 = vadd.f32 0.0036580483, %v251_v36 }
 0x225   :  { %v216_v49 = vadd.f32 0.18741608, %v215_v45 }
 0x226   :  { %v228_v41 = vmul.f32 %v227_v38, %v208_v12  ;;  %v264_v43 = vmul.f32 %v263_v40, %v248_v26  ;;  %v253_v47 = vmul.f32 %v252_v42, %v248_v26 }
 0x227   :  { %v217_v54 = vmul.f32 %v216_v49, %v208_v12  ;;  %v465_v49 = vld [vmem:[%s765_s6 + $0x10] sm:$0xff] }
 0x228   :  { %v229_v44 = vadd.f32 1.0, %v228_v41  ;;  %v265_v46 = vadd.f32 0.112945676, %v264_v43  ;;  %v254_v51 = vadd.f32 0.05243302, %v253_v47 }
 0x229   :  { %v218_v60 = vadd.f32 1.1283791, %v217_v54 }
 0x22a   :  { %535 = vrcp.f32 %v229_v44  ;;  %v266_v48 = vmul.f32 %v265_v46, %v248_v26  ;;  %v255_v57 = vmul.f32 %v254_v51, %v248_v26  ;;  %v241_v59 = vand.u32 2147483648, %v229_v44  ;;  %v464_v51 = vld [vmem:[%s765_s6 + $0x8] sm:$0xff] }
 0x22b   :  { %v239_v62 = vand.u32 2147483647, %v229_v44  ;;  %vm235_vm14 = vweird.f32 %v229_v44  ;;  %v219_v3 = vmul.f32 %v218_v60, %v205_v8 }
 0x22c   :  { %v267_v50 = vadd.f32 0.4994258, %v266_v48  ;;  %v256_v63 = vadd.f32 0.18741608, %v255_v57  ;;  %v242_v1 = vor.u32 1.1754944e-38, %v241_v59  ;;  %v466_v48 = vld [vmem:[%s765_s6 + $0x18] sm:$0xff] }
 0x22d   :  { %vm240_vm0 = vcmp.eq.f32.partialorder %v239_v62, 8.507059e+37  ;;  %486 = vmatpush.msra.mxu3 %v466_v48 }
 0x22e   :  { %v268_v52 = vmul.f32 %v267_v50, %v248_v26  ;;  %v257_v7 = vmul.f32 %v256_v63, %v248_v26 }
 0x22f   :  { %487 = vmatpush.msra.mxu3 %v465_v49 }
 0x230   :  { %v536_v53 = vpop.eup %535  ;;  %v269_v56 = vadd.f32 1.0, %v268_v52  ;;  %v258_v14 = vadd.f32 1.1283791, %v257_v7 }
 0x231   :  { %v231_v55 = vmul.f32 %v536_v53, %v229_v44  ;;  %vm236_vm13 = vweird.f32 %v536_v53  ;;  %488 = vmatpush.msra.mxu3 %v464_v51 }
 0x232   :  { %537 = vrcp.f32 %v269_v56  ;;  %vm237_vm15 = vmor %vm235_vm14, %vm236_vm13  ;;  %v281_v13 = vand.u32 2147483648, %v269_v56  ;;  %v279_v18 = vand.u32 2147483647, %v269_v56  ;;  %vm275_vm2 = vweird.f32 %v269_v56 }
 0x233   :  { %v232_v58 = vsub.f32 1.0, %v231_v55  ;;  %v259_v24 = vmul.f32 %v258_v14, %v700_v20 }
 0x234   :  { %v282_v8 = vor.u32 1.1754944e-38, %v281_v13  ;;  %vm280_vm4 = vcmp.eq.f32.partialorder %v279_v18, 8.507059e+37 }
 0x235   :  { %v233_v61 = vmul.f32 %v536_v53, %v232_v58 }
 0x237   :  { %v234_v0 = vadd.f32 %v536_v53, %v233_v61 }
 0x238   :  { %v538_v2 = vpop.eup %537 }
 0x239   :  { %v238_v4 = vsel %vm237_vm15, %v536_v53, %v234_v0  ;;  %v271_v9 = vmul.f32 %v538_v2, %v269_v56  ;;  %vm276_vm1 = vweird.f32 %v538_v2  ;;  %v463_v53 = vld [vmem:[%s765_s6] sm:$0xff] }
 0x23a   :  { %v243_v5 = vsel %vm240_vm0, %v242_v1, %v238_v4  ;;  %vm277_vm3 = vmor %vm275_vm2, %vm276_vm1  ;;  %489 = vmatpush.msra.mxu3 %v463_v53  ;;  %v369_v1 = vperm.slane %v667_v16, 4 }
 0x23b   :  { %v244_v10 = vmul.f32 %v243_v5, %v219_v3  ;;  %v272_v11 = vsub.f32 1.0, %v271_v9 }
 0x23d   :  { %v513_v12 = vclamps-f32 %v244_v10, 1.0  ;;  %v273_v15 = vmul.f32 %v538_v2, %v272_v11 }
 0x23f   :  { %v287_v21 = vadd.f32 1.0, %v513_v12  ;;  %v274_v22 = vadd.f32 %v538_v2, %v273_v15 }
 0x241   :  { %v289_v23 = vmul.f32 %v287_v21, %v203_v19  ;;  %v278_v25 = vsel %vm277_vm3, %v538_v2, %v274_v22 }
 0x242   :  { %v283_v26 = vsel %vm280_vm4, %v282_v8, %v278_v25  ;;  %vm497_vm4 = vcmask 64512  }
 0x243   :  { %515 = vmatmul.msk.f32.vlgmr.msra.gmra.mxu2 %vm145_vm5, %v289_v23  ;;  %v284_v27 = vmul.f32 %v283_v26, %v259_v24 }
 0x245   :  { %v514_v28 = vclamps-f32 %v284_v27, 1.0 }
 0x247   :  { %v288_v30 = vadd.f32 1.0, %v514_v28 }
 0x249   :  { %v290_v31 = vmul.f32 %v288_v30, %v204_v29 }
 0x24b   :  { %516 = vmatmul.msk.f32.gmra.mxu2 %vm145_vm5, %v290_v31 }
 0x2c6   :  { %v319_v32 = vpop.f32.mrf.mxu2 }
 0x2c7   :  { %v320_v34 = vadd.f32 %v319_v32, %v295_v6 }
 0x2c9   :  { %v325_v35 = vsel %vm145_vm5, %v320_v34, 0.0 }
 0x2ca   :  { %326 = vadd.xlane.f32.xlu0 %v325_v35 }
 0x2ce   :  { %v322_v20 = vpop.f32.mrf.mxu2 }
 0x2cf   :  { %v323_v36 = vadd.f32 %v322_v20, %v295_v6 }
 0x2d1   :  { %v328_v37 = vsel %vm145_vm5, %v323_v36, 0.0 }
 0x2d2   :  { %329 = vadd.xlane.f32.xlu1 %v328_v37 }
 0x33d   :  { %v327_v38 = vpop.xlane.xlu0 %326 }
 0x33e   :  { %v331_v39 = vmul.f32 %v327_v38, %v672_v33 }
 0x340   :  { %v333_v17 = vsub.f32 %v320_v34, %v331_v39 }
 0x342   :  { %v335_v40 = vmul.f32 %v333_v17, %v333_v17 }
 0x344   :  { %v337_v41 = vsel %vm145_vm5, %v335_v40, 0.0 }
 0x345   :  { %338 = vadd.xlane.f32.xlu2 %v337_v41  ;;  %v330_v42 = vpop.xlane.xlu1 %329 }
 0x346   :  { %v332_v43 = vmul.f32 %v330_v42, %v672_v33 }
 0x348   :  { %v334_v44 = vsub.f32 %v323_v36, %v332_v43 }
 0x34a   :  { %v336_v45 = vmul.f32 %v334_v44, %v334_v44 }
 0x34c   :  { %v340_v46 = vsel %vm145_vm5, %v336_v45, 0.0 }
 0x34d   :  { %341 = vadd.xlane.f32.xlu1 %v340_v46 }
 0x3b8   :  { %v339_v47 = vpop.xlane.xlu2 %338 }
 0x3b9   :  { %v343_v50 = vmul.f32 %v339_v47, %v672_v33 }
 0x3bb   :  { %v345_v52 = vadd.f32 1e-05, %v343_v50 }
 0x3bd   :  { %539 = vrsqrt.f32 %v345_v52  ;;  %vm353_vm7 = vweird.f32 %v345_v52 }
 0x3c0   :  { %v342_v54 = vpop.xlane.xlu1 %341 }
 0x3c1   :  { %v344_v55 = vmul.f32 %v342_v54, %v672_v33  ;;  %v372_v33 = vperm.slane %v667_v16, 5 }
 0x3c3   :  { %v540_v56 = vpop.eup %539  ;;  %v346_v58 = vadd.f32 1e-05, %v344_v55 }
 0x3c4   :  { %v348_v57 = vmul.f32 %v540_v56, %v345_v52  ;;  %vm354_vm6 = vweird.f32 %v540_v56 }
 0x3c5   :  { %541 = vrsqrt.f32 %v346_v58  ;;  %vm355_vm8 = vmor %vm353_vm7, %vm354_vm6  ;;  %vm363_vm10 = vweird.f32 %v346_v58 }
 0x3c6   :  { %v349_v59 = vmul.f32 %v540_v56, %v348_v57 }
 0x3c8   :  { %v350_v60 = vmul.f32 0.5, %v349_v59 }
 0x3ca   :  { %v351_v61 = vsub.f32 1.5, %v350_v60 }
 0x3cb   :  { %v542_v62 = vpop.eup %541 }
 0x3cc   :  { %v352_v63 = vmul.f32 %v540_v56, %v351_v61  ;;  %v358_v0 = vmul.f32 %v542_v62, %v346_v58  ;;  %vm364_vm9 = vweird.f32 %v542_v62 }
 0x3cd   :  { %vm365_vm11 = vmor %vm363_vm10, %vm364_vm9 }
 0x3ce   :  { %v356_v2 = vsel %vm355_vm8, %v540_v56, %v352_v63  ;;  %v359_v4 = vmul.f32 %v542_v62, %v358_v0 }
 0x3cf   :  { %v367_v3 = vmul.f32 %v356_v2, %v333_v17 }
 0x3d0   :  { %v360_v5 = vmul.f32 0.5, %v359_v4 }
 0x3d1   :  { %v370_v7 = vmul.f32 %v369_v1, %v367_v3 }
 0x3d2   :  { %v361_v9 = vsub.f32 1.5, %v360_v5 }
 0x3d3   :  { %v732_v10 = vadd.f32 %v372_v33, %v370_v7 }
 0x3d4   :  { %v362_v11 = vmul.f32 %v542_v62, %v361_v9 }
 0x3d5   :  { %v735_v12 = vmul.f32 0.70710677, %v732_v10 }
 0x3d6   :  { %v366_v13 = vsel %vm365_vm11, %v542_v62, %v362_v11 }
 0x3d7   :  { %v379_v14 = vmul.f32 %v735_v12, %v735_v12  ;;  %v368_v15 = vmul.f32 %v366_v13, %v334_v44 }
 0x3d9   :  { %v380_v18 = vmin.f32 %v379_v14, 16.0  ;;  %v371_v19 = vmul.f32 %v369_v1, %v368_v15 }
 0x3db   :  { %v381_v21 = vmul.f32 2.1237322e-06, %v380_v18  ;;  %v392_v22 = vmul.f32 3.8918573e-05, %v380_v18  ;;  %v739_v23 = vadd.f32 %v372_v33, %v371_v19 }
 0x3dd   :  { %v382_v8 = vadd.f32 0.00028619796, %v381_v21  ;;  %v393_v24 = vadd.f32 0.001143296, %v392_v22  ;;  %v742_v25 = vmul.f32 0.70710677, %v739_v23 }
 0x3df   :  { %v383_v26 = vmul.f32 %v382_v8, %v380_v18  ;;  %v394_v27 = vmul.f32 %v393_v24, %v380_v18  ;;  %v419_v28 = vmul.f32 %v742_v25, %v742_v25  ;;  %v375_v8 = vmul.f32 0.5, %v732_v10 }
 0x3e0   :  { %v467_v10 = vperm.slane %v667_v16, 6 }
 0x3e1   :  { %v395_v29 = vadd.f32 0.014752088, %v394_v27  ;;  %v384_v30 = vadd.f32 0.0036580483, %v383_v26  ;;  %v420_v31 = vmin.f32 %v419_v28, 16.0 }
 0x3e3   :  { %v396_v6 = vmul.f32 %v395_v29, %v380_v18  ;;  %v421_v32 = vmul.f32 2.1237322e-06, %v420_v31  ;;  %v432_v34 = vmul.f32 3.8918573e-05, %v420_v31  ;;  %v385_v20 = vmul.f32 %v384_v30, %v380_v18 }
 0x3e5   :  { %v397_v35 = vadd.f32 0.112945676, %v396_v6  ;;  %v422_v36 = vadd.f32 0.00028619796, %v421_v32  ;;  %v433_v37 = vadd.f32 0.001143296, %v432_v34 }
 0x3e6   :  { %v386_v41 = vadd.f32 0.05243302, %v385_v20  ;;  %v376_v32 = vmul.f32 0.5, %v739_v23 }
 0x3e7   :  { %v398_v38 = vmul.f32 %v397_v35, %v380_v18  ;;  %v423_v39 = vmul.f32 %v422_v36, %v420_v31  ;;  %v434_v17 = vmul.f32 %v433_v37, %v420_v31 }
 0x3e8   :  { %v387_v47 = vmul.f32 %v386_v41, %v380_v18 }
 0x3e9   :  { %v399_v40 = vadd.f32 0.4994258, %v398_v38  ;;  %v435_v42 = vadd.f32 0.014752088, %v434_v17  ;;  %v424_v44 = vadd.f32 0.0036580483, %v423_v39 }
 0x3ea   :  { %v388_v51 = vadd.f32 0.18741608, %v387_v47 }
 0x3eb   :  { %v400_v43 = vmul.f32 %v399_v40, %v380_v18  ;;  %v436_v45 = vmul.f32 %v435_v42, %v420_v31  ;;  %v425_v49 = vmul.f32 %v424_v44, %v420_v31 }
 0x3ec   :  { %v389_v56 = vmul.f32 %v388_v51, %v380_v18 }
 0x3ed   :  { %v401_v46 = vadd.f32 1.0, %v400_v43  ;;  %v437_v48 = vadd.f32 0.112945676, %v436_v45  ;;  %v426_v53 = vadd.f32 0.05243302, %v425_v49 }
 0x3ee   :  { %v390_v62 = vadd.f32 1.1283791, %v389_v56 }
 0x3ef   :  { %543 = vrcp.f32 %v401_v46  ;;  %v438_v50 = vmul.f32 %v437_v48, %v420_v31  ;;  %v427_v59 = vmul.f32 %v426_v53, %v420_v31  ;;  %v413_v61 = vand.u32 2147483648, %v401_v46 }
 0x3f0   :  { %v411_v0 = vand.u32 2147483647, %v401_v46  ;;  %vm407_vm13 = vweird.f32 %v401_v46  ;;  %v391_v33 = vmul.f32 %v390_v62, %v735_v12 }
 0x3f1   :  { %v439_v52 = vadd.f32 0.4994258, %v438_v50  ;;  %v428_v1 = vadd.f32 0.18741608, %v427_v59  ;;  %v414_v3 = vor.u32 1.1754944e-38, %v413_v61 }
 0x3f2   :  { %vm412_vm15 = vcmp.eq.f32.partialorder %v411_v0, 8.507059e+37 }
 0x3f3   :  { %v440_v54 = vmul.f32 %v439_v52, %v420_v31  ;;  %v429_v9 = vmul.f32 %v428_v1, %v420_v31 }
 0x3f5   :  { %v544_v55 = vpop.eup %543  ;;  %v441_v58 = vadd.f32 1.0, %v440_v54  ;;  %v430_v19 = vadd.f32 1.1283791, %v429_v9 }
 0x3f6   :  { %v403_v57 = vmul.f32 %v544_v55, %v401_v46  ;;  %vm408_vm12 = vweird.f32 %v544_v55 }
 0x3f7   :  { %545 = vrcp.f32 %v441_v58  ;;  %vm409_vm14 = vmor %vm407_vm13, %vm408_vm12  ;;  %v453_v18 = vand.u32 2147483648, %v441_v58  ;;  %v451_v22 = vand.u32 2147483647, %v441_v58  ;;  %vm447_vm1 = vweird.f32 %v441_v58 }
 0x3f8   :  { %v404_v60 = vsub.f32 1.0, %v403_v57  ;;  %v431_v28 = vmul.f32 %v430_v19, %v742_v25 }
 0x3f9   :  { %v454_v12 = vor.u32 1.1754944e-38, %v453_v18  ;;  %vm452_vm3 = vcmp.eq.f32.partialorder %v451_v22, 8.507059e+37 }
 0x3fa   :  { %v405_v63 = vmul.f32 %v544_v55, %v404_v60 }
 0x3fc   :  { %v406_v2 = vadd.f32 %v544_v55, %v405_v63 }
 0x3fd   :  { %v546_v4 = vpop.eup %545 }
 0x3fe   :  { %v410_v5 = vsel %vm409_vm14, %v544_v55, %v406_v2  ;;  %v443_v11 = vmul.f32 %v546_v4, %v441_v58  ;;  %vm448_vm0 = vweird.f32 %v546_v4 }
 0x3ff   :  { %v415_v7 = vsel %vm412_vm15, %v414_v3, %v410_v5  ;;  %vm449_vm2 = vmor %vm447_vm1, %vm448_vm0 }
 0x400   :  { %v416_v13 = vmul.f32 %v415_v7, %v391_v33  ;;  %v444_v14 = vsub.f32 1.0, %v443_v11 }
 0x402   :  { %v517_v15 = vclamps-f32 %v416_v13, 1.0  ;;  %v445_v21 = vmul.f32 %v546_v4, %v444_v14 }
 0x404   :  { %v459_v24 = vadd.f32 1.0, %v517_v15  ;;  %v446_v26 = vadd.f32 %v546_v4, %v445_v21 }
 0x406   :  { %v461_v27 = vmul.f32 %v459_v24, %v375_v8  ;;  %v450_v29 = vsel %vm449_vm2, %v546_v4, %v446_v26 }
 0x407   :  { %v455_v30 = vsel %vm452_vm3, %v454_v12, %v450_v29 }
 0x408   :  { %519 = vmatmul.msk.f32.vlgmr.msra.gmra.mxu3 %vm145_vm5, %v461_v27  ;;  %v456_v31 = vmul.f32 %v455_v30, %v431_v28 }
 0x40a   :  { %v518_v6 = vclamps-f32 %v456_v31, 1.0 }
 0x40c   :  { %v460_v34 = vadd.f32 1.0, %v518_v6 }
 0x40e   :  { %v462_v35 = vmul.f32 %v460_v34, %v376_v32 }
 0x410   :  { %520 = vmatmul.msk.f32.gmra.mxu3 %vm145_vm5, %v462_v35 }
 0x48b   :  { %v491_v20 = vpop.f32.mrf.mxu3 }
 0x48c   :  { %v492_v36 = vadd.f32 %v491_v20, %v467_v10 }
 0x48e   :  { %498 = vst.msk [vmem:[%s766_s7] sm:$0xff] %vm497_vm4, %v492_v36 }
 0x493   :  { %v494_v25 = vpop.f32.mrf.mxu3 }
 0x494   :  { %v495_v37 = vadd.f32 %v494_v25, %v467_v10 }
 0x496   :  { %499 = vst.msk [vmem:[%s766_s7 + $0x8] sm:$0xff] %vm497_vm4, %v495_v37 }
 0x497   :  { %504 = vsyncpa [#allocation3], 1 }
 0x498   :  { %505 = vsyncpa [#allocation5], 1 }

</bundles_post_ra>
